<compile_context>
chip_gen: v7x
topology: tpu7x:2x2x1
jax: 0.10.0
libtpu: 0.0.40
codegen_flags: <defaults>
</compile_context>

<pallas_src>
import jax
import jax.numpy as jnp
from jax.experimental import pallas as pl
from jax.experimental.pallas import tpu as pltpu

K_STEEPNESS = 1.5          # HyperXActivation steepness
DEFAULT_BATCH_TILE = 512   # rows per grid step for large batches (multiple of 8)


def linear_hyperx_kernel(x_ref, w_ref, b_ref, o_ref):
    # (bt, IN) @ (IN, OUT) on the MXU with f32 accumulation; bias add and the
    # tanh gate run on the VPU/EUP; single (narrow, possibly masked) store.
    y = jnp.dot(x_ref[...], w_ref[...], preferred_element_type=jnp.float32)
    y = y + b_ref[...]                       # (bt, OUT) + (1, OUT)
    o_ref[...] = (y * jnp.tanh(K_STEEPNESS * y)).astype(o_ref.dtype)


def simple_model_forward(x, w, b, *, batch_tile=DEFAULT_BATCH_TILE):
    """x: (B, IN), w: (IN, OUT), b: (OUT,)  ->  (B, OUT) float32."""
    B, IN = x.shape
    OUT = w.shape[1]

    if B <= batch_tile:
        # Block spans the whole (unpadded) batch: legal because the block's
        # last-two dims equal the full array dims. Grid is a single step.
        bt, Bp = B, B
        x_in = x
    else:
        # Large-batch path: sublane-aligned tile, pad batch rows only (exact;
        # padded rows are sliced off before return).
        bt = batch_tile
        Bp = pl.cdiv(B, bt) * bt
        x_in = x if Bp == B else jnp.zeros((Bp, IN), x.dtype).at[:B].set(x)

    b2 = b.reshape(1, OUT)
    grid = (Bp // bt,)
    in_bytes = jnp.dtype(x.dtype).itemsize

    out = pl.pallas_call(
        linear_hyperx_kernel,
        out_shape=jax.ShapeDtypeStruct((Bp, OUT), jnp.float32),
        grid_spec=pltpu.PrefetchScalarGridSpec(
            num_scalar_prefetch=0,
            grid=grid,
            in_specs=[
                # batch-tiled activations, unpadded lane dim (== full IN)
                pl.BlockSpec((bt, IN), lambda i: (i, 0)),
                # weight: same block every step -> resident in VMEM
                pl.BlockSpec((IN, OUT), lambda i: (0, 0)),
                # bias: same block every step -> loaded once
                pl.BlockSpec((1, OUT), lambda i: (0, 0)),
            ],
            # narrow output (OUT lanes): masked store, but ~OUT*4 B/row of HBM
            # writeback instead of 512 B/row with lane padding.
            out_specs=pl.BlockSpec((bt, OUT), lambda i: (i, 0)),
        ),
        compiler_params=pltpu.CompilerParams(
            # batch axis is embarrassingly parallel -> shards across v7x's
            # two TensorCores once the grid has >=2 steps; no-op on v5e/v6e.
            dimension_semantics=("parallel",),
            vmem_limit_bytes=32 * 1024 * 1024,
        ),
        # Honest (unpadded) traffic so XLA schedules around the call sensibly.
        cost_estimate=pl.CostEstimate(
            flops=2 * Bp * IN * OUT,
            transcendentals=Bp * OUT,
            bytes_accessed=in_bytes * (Bp * IN + IN * OUT)
                           + 4 * (OUT + Bp * OUT),
        ),
    )(x_in, w, b2)

    return out if Bp == B else out[:B]


if __name__ == "__main__":
    B, IN, OUT = 2, 10, 5

    key = jax.random.PRNGKey(0)
    kx, kw, kb = jax.random.split(key, 3)

    # Deterministic synthetic params (shapes match nn.Linear(10, 5)).
    # PyTorch stores weight as (OUT, IN); transpose to (IN, OUT) so the kernel
    # computes x @ W + b directly.
    w_torch_layout = jax.random.uniform(
        kw, (OUT, IN), jnp.float32, minval=-0.3, maxval=0.3)
    b = jax.random.uniform(kb, (OUT,), jnp.float32, minval=-0.3, maxval=0.3)
    x = jax.random.normal(kx, (B, IN), jnp.float32)

    w = jnp.transpose(w_torch_layout)          # (IN, OUT)

    out = jax.block_until_ready(simple_model_forward(x, w, b))

    # Pure-JAX reference of the same semantics.
    y_ref = x @ w + b.reshape(1, OUT)
    ref = y_ref * jnp.tanh(K_STEEPNESS * y_ref)
    assert out.shape == (B, OUT), f"bad shape {out.shape}"
    assert jnp.allclose(out, ref, atol=1e-5, rtol=1e-5), "mismatch vs reference"

    print("KERNEL_OK")
</pallas_src>

<mosaic_0001>
module attributes {stable_mosaic.version = 11 : i64} {
  func.func @linear_hyperx_kernel(%arg0: i32, %arg1: memref<2x10xf32, #tpu.memory_space<vmem>>, %arg2: memref<10x5xf32, #tpu.memory_space<vmem>>, %arg3: memref<1x5xf32, #tpu.memory_space<vmem>>, %arg4: memref<2x5xf32, #tpu.memory_space<vmem>>) attributes {dimension_semantics = [#tpu.dimension_semantics<parallel>], iteration_bounds = array<i64: 1>, scalar_prefetch = 0 : i64, scratch_operands = 0 : i64, tpu.core_type = #tpu.core_type<tc>, window_params = [{transform_indices = @transform_0, window_bounds = array<i64: 2, 10>}, {pipeline_mode = #tpu.pipeline_mode<synchronous>, transform_indices = @transform_1, window_bounds = array<i64: 10, 5>}, {pipeline_mode = #tpu.pipeline_mode<synchronous>, transform_indices = @transform_2, window_bounds = array<i64: 1, 5>}, {transform_indices = @transform_3, window_bounds = array<i64: 2, 5>}]} {
    %c0 = arith.constant 0 : index
    %c0_0 = arith.constant 0 : index
    %0 = vector.load %arg1[%c0, %c0_0] : memref<2x10xf32, #tpu.memory_space<vmem>>, vector<2x10xf32>
    %c0_1 = arith.constant 0 : index
    %c0_2 = arith.constant 0 : index
    %1 = vector.load %arg2[%c0_1, %c0_2] : memref<10x5xf32, #tpu.memory_space<vmem>>, vector<10x5xf32>
    %cst = arith.constant dense<0.000000e+00> : vector<2x5xf32>
    %2 = tpu.matmul %0, %1, %cst {dimension_numbers = #tpu.dot_dimension_numbers<[1], [0], [0], [1], [0, 0, 1, 1], [], []>} : vector<2x10xf32>, vector<10x5xf32>, vector<2x5xf32> -> vector<2x5xf32>
    %c0_3 = arith.constant 0 : index
    %c0_4 = arith.constant 0 : index
    %3 = vector.load %arg3[%c0_3, %c0_4] : memref<1x5xf32, #tpu.memory_space<vmem>>, vector<1x5xf32>
    %4 = vector.broadcast %3 : vector<1x5xf32> to vector<2x5xf32>
    %5 = arith.addf %2, %4 : vector<2x5xf32>
    %cst_5 = arith.constant 1.500000e+00 : f32
    %6 = vector.broadcast %cst_5 : f32 to vector<2x5xf32>
    %7 = arith.mulf %6, %5 : vector<2x5xf32>
    %8 = math.tanh %7 : vector<2x5xf32>
    %9 = arith.mulf %5, %8 : vector<2x5xf32>
    %c0_6 = arith.constant 0 : index
    %c0_7 = arith.constant 0 : index
    %10 = vector.load %arg4[%c0_6, %c0_7] : memref<2x5xf32, #tpu.memory_space<vmem>>, vector<2x5xf32>
    tpu.vector_store %arg4[%c0_6, %c0_7], %9 {strides = array<i32>} : memref<2x5xf32, #tpu.memory_space<vmem>>, vector<2x5xf32>,
    return
  }
  func.func @transform_0(%arg0: i32) -> (i32, i32) {
    %c0_i32 = arith.constant 0 : i32
    %c0_i32_0 = arith.constant 0 : i32
    return %arg0, %c0_i32 : i32, i32
  }
  func.func @transform_1(%arg0: i32) -> (i32, i32) {
    %c0_i32 = arith.constant 0 : i32
    %c0_i32_0 = arith.constant 0 : i32
    %c0_i32_1 = arith.constant 0 : i32
    return %c0_i32, %c0_i32_0 : i32, i32
  }
  func.func @transform_2(%arg0: i32) -> (i32, i32) {
    %c0_i32 = arith.constant 0 : i32
    %c0_i32_0 = arith.constant 0 : i32
    %c0_i32_1 = arith.constant 0 : i32
    return %c0_i32, %c0_i32_0 : i32, i32
  }
  func.func @transform_3(%arg0: i32) -> (i32, i32) {
    %c0_i32 = arith.constant 0 : i32
    %c0_i32_0 = arith.constant 0 : i32
    return %arg0, %c0_i32 : i32, i32
  }
}

</mosaic_0001>

<bundles_post_ra>
// kernel: tpu_custom_call.1
= control target key start
LH: loop header
LB: loop body
LE: loop exit
PB: predicated region body
PF: predicated region fallthrough
CT: control target
= control target key end

     0   :  { %vm29_vm0 = vcmask 1041408   ;;  %v170_v2 = vmov 0.0|0.0   ;;  %vm171_vm1 = vmmov 1   ;;  %vm172_vm3 = vmmov 0   ;;  %s219_s0 = inlined_call_operand.vmem [shape: f32[2,10], index: 0, kind: input, shape index: {}]   ;;  %s220_s1 = inlined_call_operand.vmem [shape: f32[10,5], index: 1, kind: input, shape index: {}]   ;;  %s221_s2 = inlined_call_operand.vmem [shape: f32[1,5], index: 2, kind: input, shape index: {}]   ;;  %s222_s3 = inlined_call_operand.hbm [shape: f32[2,5], index: 3, kind: output, shape index: {}]  }
   0x1   :  { %v16_v0 = vld [vmem:[%s220_s1] sm:$0xff]  ;;  %v17_v1 = vld [vmem:[%s220_s1 + $0x8] sm:$0x3]  ;;  %135 = vmatprep.subr.bf16.mxu0 %v170_v2  ;;  %vm137_vm2 = vmpackc.low %vm29_vm0, %vm171_vm1  ;;  %v173_v4 = vmov 0.0  }
   0x2   :  { %v136_v3 = vpack.c.bf16 %v17_v1, %v16_v0  ;;  %132 = vmatprep.mubr.msk.f32.mxu0 %vm172_vm3, %v173_v4 }
   0x3   :  { %8 = vsyncpa [#allocation3], 0  ;;  %v15_v5 = vld [vmem:[%s219_s0] sm:$0x3]  ;;  %vm25_vm4 = vcmask 80896   ;;  %s174_s1 = smov [#allocation2]  }
   0x4   :  { %138 = vmatpush3.bf16.msk.msra.mxu0 %vm137_vm2, %v136_v3  ;;  %v122_v6 = vld [vmem:[%s221_s2] ss:$0 sm:$0xff]  ;;  %s114_s20 = sshll.u32 %s174_s1, 4  ;;  %vm106_vm5 = vcmask 33792   ;;  %s115_s20 = int_to_ptr.vmem [resolvable:$true] %s114_s20 }
   0x5   :  { %s146_s21 = scalar_lea.vmem %s115_s20, 32  ;;  %p151_p1 = scmp.lt.s32.totalorder %s115_s20, %s115_s20 }
   0x6   :  { %p147_p0 = scmp.ne.s32.totalorder %s115_s20, %s146_s21  ;;  %p152_p2 = scmp.lt.s32.totalorder %s146_s21, %s146_s21 }
   0x7   :  { %133 = vmatmul.mubr.msk.f32.vlgmr.msra.gmra.mrb[0].mxu0 %vm25_vm4, %v15_v5 }
   0x8   :  { %p153_p3 = por %p152_p2, %p151_p1 }
   0xa   :  { %p154_p4 = pnand %p153_p3, %p147_p0 }
  0xda   :  { %v99_v7 = vpop.f32.mrb[0].mxu0 }
  0xdb   :  { %v100_v8 = vadd.f32 %v122_v6, %v99_v7  ;;  %v134_v9 = vpop.f32.mrb[1].mxu0 }
  0xdd   :  { %v103_v10 = vmul.f32 1.5, %v100_v8 }
  0xdf   :  { %144 = vtanh.f32 %v103_v10 }
  0xe9   :  { %v145_v11 = vpop.eup %144 }
  0xea   :  { %v105_v12 = vmul.f32 %v145_v11, %v100_v8 }
  0xec   :  { %107 = vst.msk [vmem:[#allocation2] sm:$0x3] %vm106_vm5, %v105_v12 }
  0xed   :  { %157 = shalt.err (!%p154_p4)
}
  0xee   :  { %s158_s22 = scalar_lea.hbm %s222_s3, 32 }
  0xef   :  { %p159_p5 = scmp.ne.s32.totalorder %s222_s3, %s158_s22  ;;  %p162_p6 = scmp.lt.u32.totalorder %s158_s22, %s222_s3 }
  0xf1   :  { %p164_p7 = pnand %p162_p6, %p159_p5 }
  0xf3   :  { %167 = shalt.err (!%p164_p7)
}
  0xf4   :  { %117 = dma.vmem_to_hbm [thread:$0]  %s115_s20, 32, %s222_s3, [#allocation3]  }
  0xf5   :  { %168 = dma.done.wait [#allocation3], 32  }
  0xf6   :  { %169 = vsyncadd [#allocation3], 4294967264 }
  0xf7   :  { %121 = vsyncpa [#allocation3], 1 }

</bundles_post_ra>
